<compile_context>
chip_gen: v7x
topology: tpu7x:2x2x1
jax: 0.10.0
libtpu: 0.0.40
codegen_flags: <defaults>
</compile_context>

<pallas_src>
import math
import functools

import jax
import jax.numpy as jnp
import numpy as np
from jax.experimental import pallas as pl
from jax.experimental.pallas import tpu as pltpu


# ---------------------------------------------------------------------------
# Pallas kernel: batched-group cls_proj + LayerNorm + multihead attention
# ---------------------------------------------------------------------------
def _prompt_attn_kernel(cls_ref, wc_ref, bc_ref, g_ref, b_ref,
                        wqkv_ref, bqkv_ref, wo_ref, bo_ref, intra_ref,
                        attn_ref, intra_out_ref,
                        mix_sc,
                        *, num_heads):
    Bb, T, C = cls_ref.shape            # block_b batch elements per program
    BT = Bb * T
    Ch = C // num_heads
    bf16 = jnp.bfloat16

    cls = cls_ref[...].reshape(BT, C)   # bf16 activations (cast on host)

    # ---- cls_proj: ONE (BT, C) x (C, C) MXU matmul, f32 accumulate ----
    proj = jnp.dot(cls, wc_ref[...], preferred_element_type=jnp.float32) + bc_ref[...]

    # ---- LayerNorm over channels (eps=1e-5, biased variance), f32 ----
    mean = jnp.mean(proj, axis=-1, keepdims=True)
    var = jnp.mean((proj - mean) ** 2, axis=-1, keepdims=True)
    xn = (proj - mean) * jax.lax.rsqrt(var + 1e-5)
    xn = (xn * g_ref[...] + b_ref[...]).astype(bf16)

    # ---- fused q/k/v: single (BT, C) x (C, 3C) matmul, lane-aligned slices ----
    qkv = jnp.dot(xn, wqkv_ref[...], preferred_element_type=jnp.float32) + bqkv_ref[...]
    q = qkv[:, 0 * C:1 * C].reshape(Bb, T, C)
    k = qkv[:, 1 * C:2 * C].reshape(Bb, T, C)
    v = qkv[:, 2 * C:3 * C].reshape(Bb, T, C)

    # ---- per-head attention, batched over the Bb batch elements ----
    scale = 1.0 / math.sqrt(Ch)
    for h in range(num_heads):                      # static loop over heads
        sl = slice(h * Ch, (h + 1) * Ch)
        qh = (q[:, :, sl] * scale).astype(bf16)     # (Bb, T, Ch)
        kh = k[:, :, sl].astype(bf16)
        vh = v[:, :, sl].astype(bf16)
        # scores: 'bqc,bkc->bqk'
        s = jax.lax.dot_general(qh, kh, (((2,), (2,)), ((0,), (0,))),
                                preferred_element_type=jnp.float32)
        s = s - jnp.max(s, axis=-1, keepdims=True)  # softmax over keys (f32)
        e = jnp.exp(s)
        p = e * pl.reciprocal(jnp.sum(e, axis=-1, keepdims=True), approx=True)
        # mix: 'bqk,bkc->bqc'
        mix_h = jax.lax.dot_general(p.astype(bf16), vh, (((2,), (1,)), ((0,), (0,))),
                                    preferred_element_type=jnp.float32)
        # stash head output in its lane slice -> one full-width out_proj later
        mix_sc[:, sl] = mix_h.reshape(BT, Ch)

    # ---- single full-width output projection + residual ----
    out = jnp.dot(mix_sc[...].astype(bf16), wo_ref[...],
                  preferred_element_type=jnp.float32) + bo_ref[...]

    attn_ref[...] = (proj + out).reshape(Bb, T, C)              # cls_proj + attn(...)
    intra_out_ref[...] = intra_ref[...][None, :, :] + proj.reshape(Bb, T, C)


def _pick_block_b(B, T, max_rows=512):
    """Largest divisor of B with block_b*T <= max_rows, keeping >=2 grid steps
    when B >= 2 (so v7x can shard the 'parallel' grid over both TensorCores)."""
    best = 1
    for d in range(1, B + 1):
        if B % d:
            continue
        if d * T > max_rows:
            continue
        if B >= 2 and B // d < 2:
            continue
        best = d
    return best


def prompt_attention(cls_bf16, intra, params, num_heads, block_b):
    """cls_bf16: (B, T, C) bf16; intra: (T, C) f32. Returns (attn_out, intra_out), f32."""
    B, T, C = cls_bf16.shape
    bf16 = jnp.bfloat16

    # weights cast to bf16 at the pallas_call boundary; biases stay f32
    wc = params['wc'].astype(bf16)
    w_qkv = jnp.concatenate([params['wq'], params['wk'], params['wv']], axis=1).astype(bf16)
    b_qkv = jnp.concatenate([params['bq'], params['bk'], params['bv']], axis=1)
    wo = params['wo'].astype(bf16)

    kern = functools.partial(_prompt_attn_kernel, num_heads=num_heads)

    blk = pl.BlockSpec((block_b, T, C), lambda b: (b, 0, 0))

    def full_spec(shape):
        return pl.BlockSpec(shape, lambda b, _s=shape: tuple(0 for _ in _s))

    grid_spec = pltpu.PrefetchScalarGridSpec(
        num_scalar_prefetch=0,
        grid=(B // block_b,),
        in_specs=[blk,
                  full_spec((C, C)), full_spec((1, C)),          # cls_proj
                  full_spec((1, C)), full_spec((1, C)),          # LayerNorm gamma/beta
                  full_spec((C, 3 * C)), full_spec((1, 3 * C)),  # fused qkv
                  full_spec((C, C)), full_spec((1, C)),          # out_proj
                  full_spec((T, C))],                            # intra prompts
        out_specs=(blk, blk),
        scratch_shapes=[pltpu.VMEM((block_b * T, C), jnp.float32)],
    )

    out_shape = (jax.ShapeDtypeStruct((B, T, C), jnp.float32),
                 jax.ShapeDtypeStruct((B, T, C), jnp.float32))

    # NOTE: at production C (768/1024) set vmem_limit_bytes explicitly and keep
    # weight buffering shallow for v7x's 64 MiB VMEM; defaults are fine here.
    return pl.pallas_call(
        kern,
        grid_spec=grid_spec,
        out_shape=out_shape,
        compiler_params=pltpu.CompilerParams(dimension_semantics=("parallel",)),
    )(cls_bf16,
      wc, params['bc'],
      params['ln_g'], params['ln_b'],
      w_qkv, b_qkv,
      wo, params['bo'],
      intra)


# ---------------------------------------------------------------------------
# Full InsertEventPrompt.forward (single-pass token assembly)
# ---------------------------------------------------------------------------
def insert_event_prompt_forward(x, B, T, params, num_heads, num_frames):
    BT, N0, C = x.shape

    intra = params['intra']                                    # (num_frames, C)
    if T != num_frames:
        intra = jnp.tile(intra, (T // num_frames, 1))          # (T, C)

    # cls tokens (event-prompt insertion does not change index 0)
    cls_bf16 = x[:, 0, :].reshape(B, T, C).astype(jnp.bfloat16)
    block_b = _pick_block_b(B, T)
    attn_out, intra_part = prompt_attention(cls_bf16, intra, params, num_heads, block_b)

    # event modality prompts (broadcast, no copy until the final concat)
    P = params['event_prompts'].shape[0]
    ep = jnp.broadcast_to(params['event_prompts'][None], (BT, P, C))

    # repeat_interleave(intra_part, T, dim=0) as broadcast + reshape
    intra_i = jnp.broadcast_to(intra_part[:, None], (B, T, T, C)).reshape(BT, T, C)

    # single-pass final assembly — equivalent to the module's three concats:
    # [CLS, intra(T), event_prompts(P), rest(N0-1), cross_frame(1)]
    x_out = jnp.concatenate([x[:, :1, :],
                             intra_i,
                             ep,
                             x[:, 1:, :],
                             attn_out.reshape(BT, 1, C)], axis=1)
    return x_out, num_frames


# ---------------------------------------------------------------------------
# Pure-JAX reference (mirrors the PyTorch forward; matmul operands in bf16 to
# match the kernel's MXU precision so the check can stay tight)
# ---------------------------------------------------------------------------
def reference_forward(x, B, T, params, num_heads, num_frames):
    BT, N0, C = x.shape
    bf = jnp.bfloat16
    P = params['event_prompts'].shape[0]

    ep = jnp.broadcast_to(params['event_prompts'][None], (BT, P, C))
    x = jnp.concatenate([x[:, :1, :], ep, x[:, 1:, :]], axis=1)

    cls = x[:, 0, :].reshape(B, T, C)
    proj = jnp.dot(cls.astype(bf), params['wc'].astype(bf),
                   preferred_element_type=jnp.float32) + params['bc'][0]
    mean = proj.mean(-1, keepdims=True)
    var = ((proj - mean) ** 2).mean(-1, keepdims=True)
    xn = (proj - mean) * jax.lax.rsqrt(var + 1e-5) * params['ln_g'][0] + params['ln_b'][0]
    xn16 = xn.astype(bf)

    q = jnp.dot(xn16, params['wq'].astype(bf), preferred_element_type=jnp.float32) + params['bq'][0]
    k = jnp.dot(xn16, params['wk'].astype(bf), preferred_element_type=jnp.float32) + params['bk'][0]
    v = jnp.dot(xn16, params['wv'].astype(bf), preferred_element_type=jnp.float32) + params['bv'][0]
    H, Ch = num_heads, C // num_heads
    q = q.reshape(B, T, H, Ch)
    k = k.reshape(B, T, H, Ch)
    v = v.reshape(B, T, H, Ch)
    aff = jnp.einsum('nqhc,nkhc->nqkh',
                     (q * (1.0 / math.sqrt(Ch))).astype(bf), k.astype(bf),
                     preferred_element_type=jnp.float32)
    aff = jax.nn.softmax(aff, axis=-2)
    mix = jnp.einsum('nqlh,nlhc->nqhc', aff.astype(bf), v.astype(bf),
                     preferred_element_type=jnp.float32).reshape(B, T, C)
    attn = proj + (jnp.dot(mix.astype(bf), params['wo'].astype(bf),
                           preferred_element_type=jnp.float32) + params['bo'][0])

    x = jnp.concatenate([x, attn.reshape(BT, 1, C)], axis=1)

    intra = params['intra']
    if T != num_frames:
        intra = jnp.tile(intra, (T // num_frames, 1))
    intra = intra[None] + proj                                  # (B, T, C)
    intra_i = jnp.repeat(intra, T, axis=0)
    x = jnp.concatenate([x[:, :1, :], intra_i, x[:, 1:, :]], axis=1)
    return x, num_frames


# ---------------------------------------------------------------------------
# Deterministic parameter initialization (matches the module's init scheme)
# ---------------------------------------------------------------------------
def init_params(key, C, num_frames, num_event_prompts, patch_size=(16, 16)):
    ks = jax.random.split(key, 8)
    xav = math.sqrt(6.0 / (C + C))                              # xavier_uniform
    val = math.sqrt(6.0 / float(3 * patch_size[0] * patch_size[1] + C))
    kai = 1.0 / math.sqrt(C)                                    # default Linear init bound
    f32 = jnp.float32
    return {
        # cls_proj (weights stored transposed: (in, out) so y = x @ W + b)
        'wc': jax.random.uniform(ks[0], (C, C), f32, -kai, kai),
        'bc': jax.random.uniform(ks[1], (1, C), f32, -kai, kai),
        # LayerNorm
        'ln_g': jnp.ones((1, C), f32),
        'ln_b': jnp.zeros((1, C), f32),
        # Attention projections (xavier_uniform weights, zero bias)
        'wq': jax.random.uniform(ks[2], (C, C), f32, -xav, xav),
        'bq': jnp.zeros((1, C), f32),
        'wk': jax.random.uniform(ks[3], (C, C), f32, -xav, xav),
        'bk': jnp.zeros((1, C), f32),
        'wv': jax.random.uniform(ks[4], (C, C), f32, -xav, xav),
        'bv': jnp.zeros((1, C), f32),
        'wo': jax.random.uniform(ks[5], (C, C), f32, -xav, xav),
        'bo': jnp.zeros((1, C), f32),
        # prompt parameters
        'event_prompts': jax.random.uniform(ks[6], (num_event_prompts, C), f32, -val, val),
        'intra': jax.random.uniform(ks[7], (num_frames, C), f32, -val, val),
    }


if __name__ == "__main__":
    # small shapes consistent with the module (feature_dim scaled down to 128)
    B, T, C = 2, 8, 128
    num_heads = 4
    num_frames = T
    num_event_prompts = 4
    N0 = 1 + 16                       # CLS + 16 patch tokens per frame

    key = jax.random.PRNGKey(0)
    kx, kp = jax.random.split(key)
    x = jax.random.normal(kx, (B * T, N0, C), jnp.float32)
    params = init_params(kp, C, num_frames, num_event_prompts)

    fwd = jax.jit(insert_event_prompt_forward, static_argnums=(1, 2, 4, 5))
    out, shape = fwd(x, B, T, params, num_heads, num_frames)
    out = jax.block_until_ready(out)

    ref, _ = reference_forward(x, B, T, params, num_heads, num_frames)
    expected_N = N0 + num_event_prompts + 1 + T   # +event, +cross-frame, +intra
    assert out.shape == (B * T, expected_N, C), out.shape
    assert int(shape) == num_frames
    np.testing.assert_allclose(np.asarray(out), np.asarray(ref), rtol=1e-2, atol=1e-2)
    print("KERNEL_OK")
</pallas_src>

<mosaic_0001>
module attributes {stable_mosaic.version = 11 : i64} {
  func.func @_prompt_attn_kernel(%arg0: i32, %arg1: memref<1x8x128xbf16, #tpu.memory_space<vmem>>, %arg2: memref<128x128xbf16, #tpu.memory_space<vmem>>, %arg3: memref<1x128xf32, #tpu.memory_space<vmem>>, %arg4: memref<1x128xf32, #tpu.memory_space<vmem>>, %arg5: memref<1x128xf32, #tpu.memory_space<vmem>>, %arg6: memref<128x384xbf16, #tpu.memory_space<vmem>>, %arg7: memref<1x384xf32, #tpu.memory_space<vmem>>, %arg8: memref<128x128xbf16, #tpu.memory_space<vmem>>, %arg9: memref<1x128xf32, #tpu.memory_space<vmem>>, %arg10: memref<8x128xf32, #tpu.memory_space<vmem>>, %arg11: memref<1x8x128xf32, #tpu.memory_space<vmem>>, %arg12: memref<1x8x128xf32, #tpu.memory_space<vmem>>, %arg13: memref<8x128xf32, #tpu.memory_space<vmem>>) attributes {dimension_semantics = [#tpu.dimension_semantics<parallel>], iteration_bounds = array<i64: 2>, scalar_prefetch = 0 : i64, scratch_operands = 1 : i64, tpu.core_type = #tpu.core_type<tc>, window_params = [{transform_indices = @transform_0, window_bounds = array<i64: 1, 8, 128>}, {pipeline_mode = #tpu.pipeline_mode<synchronous>, transform_indices = @transform_1, window_bounds = array<i64: 128, 128>}, {pipeline_mode = #tpu.pipeline_mode<synchronous>, transform_indices = @transform_2, window_bounds = array<i64: 1, 128>}, {pipeline_mode = #tpu.pipeline_mode<synchronous>, transform_indices = @transform_3, window_bounds = array<i64: 1, 128>}, {pipeline_mode = #tpu.pipeline_mode<synchronous>, transform_indices = @transform_4, window_bounds = array<i64: 1, 128>}, {pipeline_mode = #tpu.pipeline_mode<synchronous>, transform_indices = @transform_5, window_bounds = array<i64: 128, 384>}, {pipeline_mode = #tpu.pipeline_mode<synchronous>, transform_indices = @transform_6, window_bounds = array<i64: 1, 384>}, {pipeline_mode = #tpu.pipeline_mode<synchronous>, transform_indices = @transform_7, window_bounds = array<i64: 128, 128>}, {pipeline_mode = #tpu.pipeline_mode<synchronous>, transform_indices = @transform_8, window_bounds = array<i64: 1, 128>}, {pipeline_mode = #tpu.pipeline_mode<synchronous>, transform_indices = @transform_9, window_bounds = array<i64: 8, 128>}, {transform_indices = @transform_10, window_bounds = array<i64: 1, 8, 128>}, {transform_indices = @transform_11, window_bounds = array<i64: 1, 8, 128>}]} {
    %c0 = arith.constant 0 : index
    %c0_0 = arith.constant 0 : index
    %c0_1 = arith.constant 0 : index
    %0 = vector.load %arg1[%c0, %c0_0, %c0_1] : memref<1x8x128xbf16, #tpu.memory_space<vmem>>, vector<1x8x128xbf16>
    %1 = vector.shape_cast %0 : vector<1x8x128xbf16> to vector<8x128xbf16>
    %c0_2 = arith.constant 0 : index
    %c0_3 = arith.constant 0 : index
    %2 = vector.load %arg2[%c0_2, %c0_3] : memref<128x128xbf16, #tpu.memory_space<vmem>>, vector<128x128xbf16>
    %cst = arith.constant dense<0.000000e+00> : vector<8x128xf32>
    %3 = tpu.matmul %1, %2, %cst {dimension_numbers = #tpu.dot_dimension_numbers<[1], [0], [0], [1], [0, 0, 1, 1], [], []>} : vector<8x128xbf16>, vector<128x128xbf16>, vector<8x128xf32> -> vector<8x128xf32>
    %c0_4 = arith.constant 0 : index
    %c0_5 = arith.constant 0 : index
    %4 = vector.load %arg3[%c0_4, %c0_5] : memref<1x128xf32, #tpu.memory_space<vmem>>, vector<1x128xf32>
    %5 = vector.broadcast %4 : vector<1x128xf32> to vector<8x128xf32>
    %6 = arith.addf %3, %5 : vector<8x128xf32>
    %cst_6 = arith.constant dense<0.000000e+00> : vector<8xf32>
    %7 = vector.multi_reduction <add>, %6, %cst_6 [1] : vector<8x128xf32> to vector<8xf32>
    %8 = vector.shape_cast %7 : vector<8xf32> to vector<8x1xf32>
    %cst_7 = arith.constant 1.280000e+02 : f32
    %9 = vector.broadcast %cst_7 : f32 to vector<8x1xf32>
    %10 = arith.divf %8, %9 : vector<8x1xf32>
    %11 = vector.broadcast %10 : vector<8x1xf32> to vector<8x128xf32>
    %12 = arith.subf %6, %11 : vector<8x128xf32>
    %13 = arith.mulf %12, %12 : vector<8x128xf32>
    %cst_8 = arith.constant dense<0.000000e+00> : vector<8xf32>
    %14 = vector.multi_reduction <add>, %13, %cst_8 [1] : vector<8x128xf32> to vector<8xf32>
    %15 = vector.shape_cast %14 : vector<8xf32> to vector<8x1xf32>
    %cst_9 = arith.constant 1.280000e+02 : f32
    %16 = vector.broadcast %cst_9 : f32 to vector<8x1xf32>
    %17 = arith.divf %15, %16 : vector<8x1xf32>
    %18 = vector.broadcast %10 : vector<8x1xf32> to vector<8x128xf32>
    %19 = arith.subf %6, %18 : vector<8x128xf32>
    %cst_10 = arith.constant 9.99999974E-6 : f32
    %20 = vector.broadcast %cst_10 : f32 to vector<8x1xf32>
    %21 = arith.addf %17, %20 : vector<8x1xf32>
    %22 = math.rsqrt %21 : vector<8x1xf32>
    %23 = vector.broadcast %22 : vector<8x1xf32> to vector<8x128xf32>
    %24 = arith.mulf %19, %23 : vector<8x128xf32>
    %c0_11 = arith.constant 0 : index
    %c0_12 = arith.constant 0 : index
    %25 = vector.load %arg4[%c0_11, %c0_12] : memref<1x128xf32, #tpu.memory_space<vmem>>, vector<1x128xf32>
    %26 = vector.broadcast %25 : vector<1x128xf32> to vector<8x128xf32>
    %27 = arith.mulf %24, %26 : vector<8x128xf32>
    %c0_13 = arith.constant 0 : index
    %c0_14 = arith.constant 0 : index
    %28 = vector.load %arg5[%c0_13, %c0_14] : memref<1x128xf32, #tpu.memory_space<vmem>>, vector<1x128xf32>
    %29 = vector.broadcast %28 : vector<1x128xf32> to vector<8x128xf32>
    %30 = arith.addf %27, %29 : vector<8x128xf32>
    %31 = arith.truncf %30 : vector<8x128xf32> to vector<8x128xbf16>
    %c0_15 = arith.constant 0 : index
    %c0_16 = arith.constant 0 : index
    %32 = vector.load %arg6[%c0_15, %c0_16] : memref<128x384xbf16, #tpu.memory_space<vmem>>, vector<128x384xbf16>
    %cst_17 = arith.constant dense<0.000000e+00> : vector<8x384xf32>
    %33 = tpu.matmul %31, %32, %cst_17 {dimension_numbers = #tpu.dot_dimension_numbers<[1], [0], [0], [1], [0, 0, 1, 1], [], []>} : vector<8x128xbf16>, vector<128x384xbf16>, vector<8x384xf32> -> vector<8x384xf32>
    %c0_18 = arith.constant 0 : index
    %c0_19 = arith.constant 0 : index
    %34 = vector.load %arg7[%c0_18, %c0_19] : memref<1x384xf32, #tpu.memory_space<vmem>>, vector<1x384xf32>
    %35 = vector.broadcast %34 : vector<1x384xf32> to vector<8x384xf32>
    %36 = arith.addf %33, %35 : vector<8x384xf32>
    %37 = vector.extract_strided_slice %36 {offsets = [0, 0], sizes = [8, 128], strides = [1, 1]} : vector<8x384xf32> to vector<8x128xf32>
    %38 = vector.shape_cast %37 : vector<8x128xf32> to vector<1x8x128xf32>
    %39 = vector.extract_strided_slice %36 {offsets = [0, 128], sizes = [8, 128], strides = [1, 1]} : vector<8x384xf32> to vector<8x128xf32>
    %40 = vector.shape_cast %39 : vector<8x128xf32> to vector<1x8x128xf32>
    %41 = vector.extract_strided_slice %36 {offsets = [0, 256], sizes = [8, 128], strides = [1, 1]} : vector<8x384xf32> to vector<8x128xf32>
    %42 = vector.shape_cast %41 : vector<8x128xf32> to vector<1x8x128xf32>
    %43 = vector.extract_strided_slice %38 {offsets = [0, 0, 0], sizes = [1, 8, 32], strides = [1, 1, 1]} : vector<1x8x128xf32> to vector<1x8x32xf32>
    %cst_20 = arith.constant 0.176776692 : f32
    %44 = vector.broadcast %cst_20 : f32 to vector<1x8x32xf32>
    %45 = arith.mulf %43, %44 : vector<1x8x32xf32>
    %46 = arith.truncf %45 : vector<1x8x32xf32> to vector<1x8x32xbf16>
    %47 = vector.extract_strided_slice %40 {offsets = [0, 0, 0], sizes = [1, 8, 32], strides = [1, 1, 1]} : vector<1x8x128xf32> to vector<1x8x32xf32>
    %48 = arith.truncf %47 : vector<1x8x32xf32> to vector<1x8x32xbf16>
    %49 = vector.extract_strided_slice %42 {offsets = [0, 0, 0], sizes = [1, 8, 32], strides = [1, 1, 1]} : vector<1x8x128xf32> to vector<1x8x32xf32>
    %50 = arith.truncf %49 : vector<1x8x32xf32> to vector<1x8x32xbf16>
    %cst_21 = arith.constant dense<0.000000e+00> : vector<1x8x8xf32>
    %51 = tpu.matmul %46, %48, %cst_21 {dimension_numbers = #tpu.dot_dimension_numbers<[2], [2], [1], [1], [0, 0, 0, 1, 1, 1], [0], [0]>} : vector<1x8x32xbf16>, vector<1x8x32xbf16>, vector<1x8x8xf32> -> vector<1x8x8xf32>
    %cst_22 = arith.constant dense<0xFF800000> : vector<1x8xf32>
    %52 = vector.multi_reduction <maximumf>, %51, %cst_22 [2] : vector<1x8x8xf32> to vector<1x8xf32>
    %53 = vector.shape_cast %52 : vector<1x8xf32> to vector<1x8x1xf32>
    %54 = vector.broadcast %53 : vector<1x8x1xf32> to vector<1x8x8xf32>
    %55 = arith.subf %51, %54 : vector<1x8x8xf32>
    %56 = math.exp %55 : vector<1x8x8xf32>
    %cst_23 = arith.constant dense<0.000000e+00> : vector<1x8xf32>
    %57 = vector.multi_reduction <add>, %56, %cst_23 [2] : vector<1x8x8xf32> to vector<1x8xf32>
    %58 = vector.shape_cast %57 : vector<1x8xf32> to vector<1x8x1xf32>
    %59 = tpu.reciprocal %58 {approx = true} : vector<1x8x1xf32> -> vector<1x8x1xf32>
    %60 = vector.broadcast %59 : vector<1x8x1xf32> to vector<1x8x8xf32>
    %61 = arith.mulf %56, %60 : vector<1x8x8xf32>
    %62 = arith.truncf %61 : vector<1x8x8xf32> to vector<1x8x8xbf16>
    %cst_24 = arith.constant dense<0.000000e+00> : vector<1x8x32xf32>
    %63 = tpu.matmul %62, %50, %cst_24 {dimension_numbers = #tpu.dot_dimension_numbers<[2], [1], [1], [2], [0, 0, 0, 1, 1, 2], [0], [0]>} : vector<1x8x8xbf16>, vector<1x8x32xbf16>, vector<1x8x32xf32> -> vector<1x8x32xf32>
    %64 = vector.shape_cast %63 : vector<1x8x32xf32> to vector<8x32xf32>
    %c0_25 = arith.constant 0 : index
    %c0_26 = arith.constant 0 : index
    %65 = vector.load %arg13[%c0_25, %c0_26] : memref<8x128xf32, #tpu.memory_space<vmem>>, vector<8x32xf32>
    tpu.vector_store %arg13[%c0_25, %c0_26], %64 {strides = array<i32>} : memref<8x128xf32, #tpu.memory_space<vmem>>, vector<8x32xf32>,
    %66 = vector.extract_strided_slice %38 {offsets = [0, 0, 32], sizes = [1, 8, 32], strides = [1, 1, 1]} : vector<1x8x128xf32> to vector<1x8x32xf32>
    %cst_27 = arith.constant 0.176776692 : f32
    %67 = vector.broadcast %cst_27 : f32 to vector<1x8x32xf32>
    %68 = arith.mulf %66, %67 : vector<1x8x32xf32>
    %69 = arith.truncf %68 : vector<1x8x32xf32> to vector<1x8x32xbf16>
    %70 = vector.extract_strided_slice %40 {offsets = [0, 0, 32], sizes = [1, 8, 32], strides = [1, 1, 1]} : vector<1x8x128xf32> to vector<1x8x32xf32>
    %71 = arith.truncf %70 : vector<1x8x32xf32> to vector<1x8x32xbf16>
    %72 = vector.extract_strided_slice %42 {offsets = [0, 0, 32], sizes = [1, 8, 32], strides = [1, 1, 1]} : vector<1x8x128xf32> to vector<1x8x32xf32>
    %73 = arith.truncf %72 : vector<1x8x32xf32> to vector<1x8x32xbf16>
    %cst_28 = arith.constant dense<0.000000e+00> : vector<1x8x8xf32>
    %74 = tpu.matmul %69, %71, %cst_28 {dimension_numbers = #tpu.dot_dimension_numbers<[2], [2], [1], [1], [0, 0, 0, 1, 1, 1], [0], [0]>} : vector<1x8x32xbf16>, vector<1x8x32xbf16>, vector<1x8x8xf32> -> vector<1x8x8xf32>
    %cst_29 = arith.constant dense<0xFF800000> : vector<1x8xf32>
    %75 = vector.multi_reduction <maximumf>, %74, %cst_29 [2] : vector<1x8x8xf32> to vector<1x8xf32>
    %76 = vector.shape_cast %75 : vector<1x8xf32> to vector<1x8x1xf32>
    %77 = vector.broadcast %76 : vector<1x8x1xf32> to vector<1x8x8xf32>
    %78 = arith.subf %74, %77 : vector<1x8x8xf32>
    %79 = math.exp %78 : vector<1x8x8xf32>
    %cst_30 = arith.constant dense<0.000000e+00> : vector<1x8xf32>
    %80 = vector.multi_reduction <add>, %79, %cst_30 [2] : vector<1x8x8xf32> to vector<1x8xf32>
    %81 = vector.shape_cast %80 : vector<1x8xf32> to vector<1x8x1xf32>
    %82 = tpu.reciprocal %81 {approx = true} : vector<1x8x1xf32> -> vector<1x8x1xf32>
    %83 = vector.broadcast %82 : vector<1x8x1xf32> to vector<1x8x8xf32>
    %84 = arith.mulf %79, %83 : vector<1x8x8xf32>
    %85 = arith.truncf %84 : vector<1x8x8xf32> to vector<1x8x8xbf16>
    %cst_31 = arith.constant dense<0.000000e+00> : vector<1x8x32xf32>
    %86 = tpu.matmul %85, %73, %cst_31 {dimension_numbers = #tpu.dot_dimension_numbers<[2], [1], [1], [2], [0, 0, 0, 1, 1, 2], [0], [0]>} : vector<1x8x8xbf16>, vector<1x8x32xbf16>, vector<1x8x32xf32> -> vector<1x8x32xf32>
    %87 = vector.shape_cast %86 : vector<1x8x32xf32> to vector<8x32xf32>
    %c0_32 = arith.constant 0 : index
    %c32 = arith.constant 32 : index
    %88 = vector.load %arg13[%c0_32, %c32] : memref<8x128xf32, #tpu.memory_space<vmem>>, vector<8x32xf32>
    tpu.vector_store %arg13[%c0_32, %c32], %87 {strides = array<i32>} : memref<8x128xf32, #tpu.memory_space<vmem>>, vector<8x32xf32>,
    %89 = vector.extract_strided_slice %38 {offsets = [0, 0, 64], sizes = [1, 8, 32], strides = [1, 1, 1]} : vector<1x8x128xf32> to vector<1x8x32xf32>
    %cst_33 = arith.constant 0.176776692 : f32
    %90 = vector.broadcast %cst_33 : f32 to vector<1x8x32xf32>
    %91 = arith.mulf %89, %90 : vector<1x8x32xf32>
    %92 = arith.truncf %91 : vector<1x8x32xf32> to vector<1x8x32xbf16>
    %93 = vector.extract_strided_slice %40 {offsets = [0, 0, 64], sizes = [1, 8, 32], strides = [1, 1, 1]} : vector<1x8x128xf32> to vector<1x8x32xf32>
    %94 = arith.truncf %93 : vector<1x8x32xf32> to vector<1x8x32xbf16>
    %95 = vector.extract_strided_slice %42 {offsets = [0, 0, 64], sizes = [1, 8, 32], strides = [1, 1, 1]} : vector<1x8x128xf32> to vector<1x8x32xf32>
    %96 = arith.truncf %95 : vector<1x8x32xf32> to vector<1x8x32xbf16>
    %cst_34 = arith.constant dense<0.000000e+00> : vector<1x8x8xf32>
    %97 = tpu.matmul %92, %94, %cst_34 {dimension_numbers = #tpu.dot_dimension_numbers<[2], [2], [1], [1], [0, 0, 0, 1, 1, 1], [0], [0]>} : vector<1x8x32xbf16>, vector<1x8x32xbf16>, vector<1x8x8xf32> -> vector<1x8x8xf32>
    %cst_35 = arith.constant dense<0xFF800000> : vector<1x8xf32>
    %98 = vector.multi_reduction <maximumf>, %97, %cst_35 [2] : vector<1x8x8xf32> to vector<1x8xf32>
    %99 = vector.shape_cast %98 : vector<1x8xf32> to vector<1x8x1xf32>
    %100 = vector.broadcast %99 : vector<1x8x1xf32> to vector<1x8x8xf32>
    %101 = arith.subf %97, %100 : vector<1x8x8xf32>
    %102 = math.exp %101 : vector<1x8x8xf32>
    %cst_36 = arith.constant dense<0.000000e+00> : vector<1x8xf32>
    %103 = vector.multi_reduction <add>, %102, %cst_36 [2] : vector<1x8x8xf32> to vector<1x8xf32>
    %104 = vector.shape_cast %103 : vector<1x8xf32> to vector<1x8x1xf32>
    %105 = tpu.reciprocal %104 {approx = true} : vector<1x8x1xf32> -> vector<1x8x1xf32>
    %106 = vector.broadcast %105 : vector<1x8x1xf32> to vector<1x8x8xf32>
    %107 = arith.mulf %102, %106 : vector<1x8x8xf32>
    %108 = arith.truncf %107 : vector<1x8x8xf32> to vector<1x8x8xbf16>
    %cst_37 = arith.constant dense<0.000000e+00> : vector<1x8x32xf32>
    %109 = tpu.matmul %108, %96, %cst_37 {dimension_numbers = #tpu.dot_dimension_numbers<[2], [1], [1], [2], [0, 0, 0, 1, 1, 2], [0], [0]>} : vector<1x8x8xbf16>, vector<1x8x32xbf16>, vector<1x8x32xf32> -> vector<1x8x32xf32>
    %110 = vector.shape_cast %109 : vector<1x8x32xf32> to vector<8x32xf32>
    %c0_38 = arith.constant 0 : index
    %c64 = arith.constant 64 : index
    %111 = vector.load %arg13[%c0_38, %c64] : memref<8x128xf32, #tpu.memory_space<vmem>>, vector<8x32xf32>
    tpu.vector_store %arg13[%c0_38, %c64], %110 {strides = array<i32>} : memref<8x128xf32, #tpu.memory_space<vmem>>, vector<8x32xf32>,
    %112 = vector.extract_strided_slice %38 {offsets = [0, 0, 96], sizes = [1, 8, 32], strides = [1, 1, 1]} : vector<1x8x128xf32> to vector<1x8x32xf32>
    %cst_39 = arith.constant 0.176776692 : f32
    %113 = vector.broadcast %cst_39 : f32 to vector<1x8x32xf32>
    %114 = arith.mulf %112, %113 : vector<1x8x32xf32>
    %115 = arith.truncf %114 : vector<1x8x32xf32> to vector<1x8x32xbf16>
    %116 = vector.extract_strided_slice %40 {offsets = [0, 0, 96], sizes = [1, 8, 32], strides = [1, 1, 1]} : vector<1x8x128xf32> to vector<1x8x32xf32>
    %117 = arith.truncf %116 : vector<1x8x32xf32> to vector<1x8x32xbf16>
    %118 = vector.extract_strided_slice %42 {offsets = [0, 0, 96], sizes = [1, 8, 32], strides = [1, 1, 1]} : vector<1x8x128xf32> to vector<1x8x32xf32>
    %119 = arith.truncf %118 : vector<1x8x32xf32> to vector<1x8x32xbf16>
    %cst_40 = arith.constant dense<0.000000e+00> : vector<1x8x8xf32>
    %120 = tpu.matmul %115, %117, %cst_40 {dimension_numbers = #tpu.dot_dimension_numbers<[2], [2], [1], [1], [0, 0, 0, 1, 1, 1], [0], [0]>} : vector<1x8x32xbf16>, vector<1x8x32xbf16>, vector<1x8x8xf32> -> vector<1x8x8xf32>
    %cst_41 = arith.constant dense<0xFF800000> : vector<1x8xf32>
    %121 = vector.multi_reduction <maximumf>, %120, %cst_41 [2] : vector<1x8x8xf32> to vector<1x8xf32>
    %122 = vector.shape_cast %121 : vector<1x8xf32> to vector<1x8x1xf32>
    %123 = vector.broadcast %122 : vector<1x8x1xf32> to vector<1x8x8xf32>
    %124 = arith.subf %120, %123 : vector<1x8x8xf32>
    %125 = math.exp %124 : vector<1x8x8xf32>
    %cst_42 = arith.constant dense<0.000000e+00> : vector<1x8xf32>
    %126 = vector.multi_reduction <add>, %125, %cst_42 [2] : vector<1x8x8xf32> to vector<1x8xf32>
    %127 = vector.shape_cast %126 : vector<1x8xf32> to vector<1x8x1xf32>
    %128 = tpu.reciprocal %127 {approx = true} : vector<1x8x1xf32> -> vector<1x8x1xf32>
    %129 = vector.broadcast %128 : vector<1x8x1xf32> to vector<1x8x8xf32>
    %130 = arith.mulf %125, %129 : vector<1x8x8xf32>
    %131 = arith.truncf %130 : vector<1x8x8xf32> to vector<1x8x8xbf16>
    %cst_43 = arith.constant dense<0.000000e+00> : vector<1x8x32xf32>
    %132 = tpu.matmul %131, %119, %cst_43 {dimension_numbers = #tpu.dot_dimension_numbers<[2], [1], [1], [2], [0, 0, 0, 1, 1, 2], [0], [0]>} : vector<1x8x8xbf16>, vector<1x8x32xbf16>, vector<1x8x32xf32> -> vector<1x8x32xf32>
    %133 = vector.shape_cast %132 : vector<1x8x32xf32> to vector<8x32xf32>
    %c0_44 = arith.constant 0 : index
    %c96 = arith.constant 96 : index
    %134 = vector.load %arg13[%c0_44, %c96] : memref<8x128xf32, #tpu.memory_space<vmem>>, vector<8x32xf32>
    tpu.vector_store %arg13[%c0_44, %c96], %133 {strides = array<i32>} : memref<8x128xf32, #tpu.memory_space<vmem>>, vector<8x32xf32>,
    %c0_45 = arith.constant 0 : index
    %c0_46 = arith.constant 0 : index
    %135 = vector.load %arg13[%c0_45, %c0_46] : memref<8x128xf32, #tpu.memory_space<vmem>>, vector<8x128xf32>
    %136 = arith.truncf %135 : vector<8x128xf32> to vector<8x128xbf16>
    %c0_47 = arith.constant 0 : index
    %c0_48 = arith.constant 0 : index
    %137 = vector.load %arg8[%c0_47, %c0_48] : memref<128x128xbf16, #tpu.memory_space<vmem>>, vector<128x128xbf16>
    %cst_49 = arith.constant dense<0.000000e+00> : vector<8x128xf32>
    %138 = tpu.matmul %136, %137, %cst_49 {dimension_numbers = #tpu.dot_dimension_numbers<[1], [0], [0], [1], [0, 0, 1, 1], [], []>} : vector<8x128xbf16>, vector<128x128xbf16>, vector<8x128xf32> -> vector<8x128xf32>
    %c0_50 = arith.constant 0 : index
    %c0_51 = arith.constant 0 : index
    %139 = vector.load %arg9[%c0_50, %c0_51] : memref<1x128xf32, #tpu.memory_space<vmem>>, vector<1x128xf32>
    %140 = vector.broadcast %139 : vector<1x128xf32> to vector<8x128xf32>
    %141 = arith.addf %138, %140 : vector<8x128xf32>
    %142 = arith.addf %6, %141 : vector<8x128xf32>
    %143 = vector.shape_cast %142 : vector<8x128xf32> to vector<1x8x128xf32>
    %c0_52 = arith.constant 0 : index
    %c0_53 = arith.constant 0 : index
    %c0_54 = arith.constant 0 : index
    %144 = vector.load %arg11[%c0_52, %c0_53, %c0_54] : memref<1x8x128xf32, #tpu.memory_space<vmem>>, vector<1x8x128xf32>
    tpu.vector_store %arg11[%c0_52, %c0_53, %c0_54], %143 {strides = array<i32>} : memref<1x8x128xf32, #tpu.memory_space<vmem>>, vector<1x8x128xf32>,
    %c0_55 = arith.constant 0 : index
    %c0_56 = arith.constant 0 : index
    %145 = vector.load %arg10[%c0_55, %c0_56] : memref<8x128xf32, #tpu.memory_space<vmem>>, vector<8x128xf32>
    %146 = vector.shape_cast %145 : vector<8x128xf32> to vector<1x8x128xf32>
    %147 = vector.shape_cast %6 : vector<8x128xf32> to vector<1x8x128xf32>
    %148 = arith.addf %146, %147 : vector<1x8x128xf32>
    %c0_57 = arith.constant 0 : index
    %c0_58 = arith.constant 0 : index
    %c0_59 = arith.constant 0 : index
    %149 = vector.load %arg12[%c0_57, %c0_58, %c0_59] : memref<1x8x128xf32, #tpu.memory_space<vmem>>, vector<1x8x128xf32>
    tpu.vector_store %arg12[%c0_57, %c0_58, %c0_59], %148 {strides = array<i32>} : memref<1x8x128xf32, #tpu.memory_space<vmem>>, vector<1x8x128xf32>,
    return
  }
  func.func @transform_0(%arg0: i32) -> (i32, i32, i32) {
    %c0_i32 = arith.constant 0 : i32
    %c0_i32_0 = arith.constant 0 : i32
    %c0_i32_1 = arith.constant 0 : i32
    return %arg0, %c0_i32, %c0_i32_0 : i32, i32, i32
  }
  func.func @transform_1(%arg0: i32) -> (i32, i32) {
    %c0_i32 = arith.constant 0 : i32
    %c0_i32_0 = arith.constant 0 : i32
    %c0_i32_1 = arith.constant 0 : i32
    return %c0_i32, %c0_i32_0 : i32, i32
  }
  func.func @transform_2(%arg0: i32) -> (i32, i32) {
    %c0_i32 = arith.constant 0 : i32
    %c0_i32_0 = arith.constant 0 : i32
    %c0_i32_1 = arith.constant 0 : i32
    return %c0_i32, %c0_i32_0 : i32, i32
  }
  func.func @transform_3(%arg0: i32) -> (i32, i32) {
    %c0_i32 = arith.constant 0 : i32
    %c0_i32_0 = arith.constant 0 : i32
    %c0_i32_1 = arith.constant 0 : i32
    return %c0_i32, %c0_i32_0 : i32, i32
  }
  func.func @transform_4(%arg0: i32) -> (i32, i32) {
    %c0_i32 = arith.constant 0 : i32
    %c0_i32_0 = arith.constant 0 : i32
    %c0_i32_1 = arith.constant 0 : i32
    return %c0_i32, %c0_i32_0 : i32, i32
  }
  func.func @transform_5(%arg0: i32) -> (i32, i32) {
    %c0_i32 = arith.constant 0 : i32
    %c0_i32_0 = arith.constant 0 : i32
    %c0_i32_1 = arith.constant 0 : i32
    return %c0_i32, %c0_i32_0 : i32, i32
  }
  func.func @transform_6(%arg0: i32) -> (i32, i32) {
    %c0_i32 = arith.constant 0 : i32
    %c0_i32_0 = arith.constant 0 : i32
    %c0_i32_1 = arith.constant 0 : i32
    return %c0_i32, %c0_i32_0 : i32, i32
  }
  func.func @transform_7(%arg0: i32) -> (i32, i32) {
    %c0_i32 = arith.constant 0 : i32
    %c0_i32_0 = arith.constant 0 : i32
    %c0_i32_1 = arith.constant 0 : i32
    return %c0_i32, %c0_i32_0 : i32, i32
  }
  func.func @transform_8(%arg0: i32) -> (i32, i32) {
    %c0_i32 = arith.constant 0 : i32
    %c0_i32_0 = arith.constant 0 : i32
    %c0_i32_1 = arith.constant 0 : i32
    return %c0_i32, %c0_i32_0 : i32, i32
  }
  func.func @transform_9(%arg0: i32) -> (i32, i32) {
    %c0_i32 = arith.constant 0 : i32
    %c0_i32_0 = arith.constant 0 : i32
    %c0_i32_1 = arith.constant 0 : i32
    return %c0_i32, %c0_i32_0 : i32, i32
  }
  func.func @transform_10(%arg0: i32) -> (i32, i32, i32) {
    %c0_i32 = arith.constant 0 : i32
    %c0_i32_0 = arith.constant 0 : i32
    %c0_i32_1 = arith.constant 0 : i32
    return %arg0, %c0_i32, %c0_i32_0 : i32, i32, i32
  }
  func.func @transform_11(%arg0: i32) -> (i32, i32, i32) {
    %c0_i32 = arith.constant 0 : i32
    %c0_i32_0 = arith.constant 0 : i32
    %c0_i32_1 = arith.constant 0 : i32
    return %arg0, %c0_i32, %c0_i32_0 : i32, i32, i32
  }
}

</mosaic_0001>

<bundles_post_ra>
// kernel: insert_event_prompt_forward.1
= control target key start
LH: loop header
LB: loop body
LE: loop exit
PB: predicated region body
PF: predicated region fallthrough
CT: control target
= control target key end

     0   :  { %s1825_s17 = smov 0   ;;  %s2106_s0 = inlined_call_operand.vmem [shape: bf16[2,8,128], index: 0, kind: input, shape index: {}]   ;;  %s2107_s1 = inlined_call_operand.vmem [shape: bf16[128,128], index: 1, kind: input, shape index: {}]   ;;  %s2108_s2 = inlined_call_operand.vmem [shape: f32[1,128], index: 2, kind: input, shape index: {}]   ;;  %s2109_s3 = inlined_call_operand.vmem [shape: f32[1,128], index: 3, kind: input, shape index: {}]   ;;  %s2110_s4 = inlined_call_operand.vmem [shape: f32[1,128], index: 4, kind: input, shape index: {}]   ;;  %s2111_s5 = inlined_call_operand.vmem [shape: bf16[128,384], index: 5, kind: input, shape index: {}]   ;;  %s2112_s6 = inlined_call_operand.vmem [shape: f32[1,384], index: 6, kind: input, shape index: {}]   ;;  %s2113_s7 = inlined_call_operand.vmem [shape: bf16[128,128], index: 7, kind: input, shape index: {}]   ;;  %s2114_s8 = inlined_call_operand.vmem [shape: f32[1,128], index: 8, kind: input, shape index: {}]   ;;  %s2115_s9 = inlined_call_operand.vmem [shape: f32[8,128], index: 9, kind: input, shape index: {}]   ;;  %s2116_s10 = inlined_call_operand.vmem [shape: f32[2,8,128], index: 10, kind: output, shape index: {0}]   ;;  %s2117_s11 = inlined_call_operand.vmem [shape: f32[2,8,128], index: 11, kind: output, shape index: {1}]  }
   0x1 LB: > { %s1458_s18 = sadd.s32 4294967295, %s1757_s17   ;;  %p1462_p0 = scmp.ge.s32.totalorder %s1757_s17, 1  ;;  %s1757_s17 = sphi %s1825_s17, %s22_s17  }
   0x2   : > { %p339_p1 = scmp.lt.s32.totalorder %s1757_s17, 3 }
   0x4   : > { %p340_p2 = pnand %p1462_p0, %p339_p1 }
   0x5   : > { %v1685_v0 = vld [vmem:[%s2107_s1] sm:$0xff] (!%p340_p2)   ;;  %v1759_v1 = vmov (!%p340_p2), 0.0   ;;  %v1686_v2 = vld [vmem:[%s2107_s1 + $0x8] sm:$0xff] (!%p340_p2)   ;;  %vm1760_vm0 = vmmov (!%p340_p2), 0   ;;  %v1687_v3 = vld [vmem:[%s2107_s1 + $0x10] sm:$0xff] (!%p340_p2)   ;;  %p381_p3 = scmp.lt.s32.totalorder (!%p340_p2), %s1458_s18, 1  ;;  %v569_v57 = vlaneseq (!%p340_p2) }
   0x6   : > { %343 = sbr.rel (%p340_p2) target bundleno = 3480 (0xd98), region = 60  ;;  %1563 = vmatprep.subr.bf16.mxu0 (!%p340_p2), %v1759_v1  ;;  %1579 = vmatprep.mubr.msk.bf16.mxu0 (!%p340_p2), %vm1760_vm0, %v1759_v1  ;;  %v1688_v4 = vld [vmem:[%s2107_s1 + $0x18] sm:$0xff] (!%p340_p2)   ;;  %v1689_v5 = vld [vmem:[%s2107_s1 + $0x20] sm:$0xff] (!%p340_p2)   ;;  %v1690_v6 = vld [vmem:[%s2107_s1 + $0x28] sm:$0xff] (!%p340_p2)   ;;  %v1761_v41 = vmov (!%p340_p2), 0   ;;  %vm797_vm1 = vcmask (!%p340_p2), 261120  }
   0x7   : > { %1564 = vmatpush3.bf16.msra.mxu0 (!%p340_p2), %v1685_v0  ;;  %v1691_v7 = vld [vmem:[%s2107_s1 + $0x30] sm:$0xff] (!%p340_p2)   ;;  %v1692_v8 = vld [vmem:[%s2107_s1 + $0x38] sm:$0xff] (!%p340_p2)   ;;  %v1466_v10 = vld [vmem:[%s2108_s2] ss:$0 sm:$0xff] (!%p340_p2)  ;;  %744 = vmatprep.mubr.bf16.mxu1 (!%p340_p2), %v1761_v41  ;;  %v570_v58 = vshrl.u32 (!%p340_p2), %v569_v57, 7  ;;  %s1762_s19 = smov (!%p340_p2), 96  }
   0x8   : > { %1565 = vmatprep.subr.bf16.mxu0 (!%p340_p2), %v1759_v1  ;;  %v1371_v12 = vld [vmem:[%s2115_s9] sm:$0xff] (!%p340_p2)  ;;  %v1696_v20 = vld [vmem:[%s2111_s5 + $0x8] ss:$12 sps:$4 sm:$0xff] (!%p340_p2)   ;;  %v1703_v29 = vld [vmem:[%s2111_s5 + $0x30] ss:$12 sps:$4 sm:$0xff] (!%p340_p2)   ;;  %vm860_vm2 = vcmask (!%p340_p2), 1043456  }
   0x9   : > { %v1693_v18 = vld [vmem:[%s2111_s5 + $0x4] ss:$12 sps:$4 sm:$0xff] (!%p340_p2)   ;;  %v1695_v19 = vld [vmem:[%s2111_s5] ss:$12 sps:$4 sm:$0xff] (!%p340_p2)   ;;  %v1697_v21 = vld [vmem:[%s2111_s5 + $0x1c] ss:$12 sps:$4 sm:$0xff] (!%p340_p2)  }
   0xa   : > { %712 = vmatprep.subr.bf16.mxu1 (!%p340_p2), %v1693_v18  ;;  %v1700_v22 = vld [vmem:[%s2111_s5 + $0x20] ss:$12 sps:$4 sm:$0xff] (!%p340_p2)   ;;  %v1699_v23 = vld [vmem:[%s2111_s5 + $0x18] ss:$12 sps:$4 sm:$0xff] (!%p340_p2)   ;;  %v1707_v32 = vld [vmem:[%s2111_s5 + $0x48] ss:$12 sps:$4 sm:$0xff] (!%p340_p2)  }
   0xb   : > { %1566 = vmatpush3.bf16.msra.mxu0 (!%p340_p2), %v1686_v2  ;;  %713 = vmatpush1.bf16.msra.mxu1 (!%p340_p2), %v1695_v19  ;;  %v1701_v24 = vld [vmem:[%s2111_s5 + $0x34] ss:$12 sps:$4 sm:$0xff] (!%p340_p2)   ;;  %v1704_v30 = vld [vmem:[%s2111_s5 + $0x38] ss:$12 sps:$4 sm:$0xff] (!%p340_p2)   ;;  %v1708_v33 = vld [vmem:[%s2111_s5 + $0x50] ss:$12 sps:$4 sm:$0xff] (!%p340_p2)  }
   0xc   : > { %1567 = vmatprep.subr.bf16.mxu0 (!%p340_p2), %v1759_v1  ;;  %714 = vmatprep.subr.bf16.mxu1 (!%p340_p2), %v1697_v21  ;;  %v1705_v31 = vld [vmem:[%s2111_s5 + $0x4c] ss:$12 sps:$4 sm:$0xff] (!%p340_p2)   ;;  %v1709_v34 = vld [vmem:[%s2111_s5 + $0x64] ss:$12 sps:$4 sm:$0xff] (!%p340_p2)   ;;  %v1712_v36 = vld [vmem:[%s2111_s5 + $0x68] ss:$12 sps:$4 sm:$0xff] (!%p340_p2)  }
   0xd   : > { %s2119_s18 = smov (!%p381_p3, %s1458_s18), 1  ;;  %v1711_v35 = vld [vmem:[%s2111_s5 + $0x60] ss:$12 sps:$4 sm:$0xff]   ;;  %v1713_v37 = vld [vmem:[%s2111_s5 + $0x7c] ss:$12 sps:$4 sm:$0xff]   ;;  %v575_v59 = vsub.s32 1, %v570_v58 }
   0xe   : > { %s1463_s14 = sshll.u32 %s2119_s18, 2  ;;  %s1464_s24 = sshll.u32 %s2119_s18, 3  ;;  %v1715_v38 = vld [vmem:[%s2111_s5 + $0x78] ss:$12 sps:$4 sm:$0xff]   ;;  %v1716_v39 = vld [vmem:[%s2111_s5 + $0x80] ss:$12 sps:$4 sm:$0xff]  }
   0xf   : > { %1568 = vmatpush3.bf16.msra.mxu0 %v1687_v3  ;;  %s384_s21 = scalar_lea.vmem %s2106_s0, %s1463_s14  ;;  %s392_s29 = scalar_lea.vmem %s2117_s11, %s1464_s24  ;;  %715 = vmatpush1.bf16.msra.mxu1 %v1699_v23  ;;  %v1717_v40 = vld [vmem:[%s2111_s5 + $0x94] ss:$12 sps:$4 sm:$0xff]   ;;  %v1719_v42 = vld [vmem:[%s2111_s5 + $0x90] ss:$12 sps:$4 sm:$0xff]   ;;  %v1720_v43 = vld [vmem:[%s2111_s5 + $0x98] ss:$12 sps:$4 sm:$0xff]  }
  0x10   : > { %1569 = vmatprep.subr.bf16.mxu0 %v1759_v1  ;;  %v394_v9 = vld [vmem:[%s384_s21] sm:$0xf]  ;;  %716 = vmatprep.subr.bf16.mxu1 %v1701_v24  ;;  %v1721_v44 = vld [vmem:[%s2111_s5 + $0xac] ss:$12 sps:$4 sm:$0xff]   ;;  %v1723_v45 = vld [vmem:[%s2111_s5 + $0xa8] ss:$12 sps:$4 sm:$0xff]  }
  0x11   : > { %v1724_v46 = vld [vmem:[%s2111_s5 + $0xb0] ss:$12 sps:$4 sm:$0xff]   ;;  %v1475_v51 = vld [vmem:[%s2109_s3] ss:$0 sm:$0xff]  ;;  %v571_v61 = vsub.s32 0, %v570_v58  ;;  %v579_v62 = vsub.s32 2, %v570_v58 }
  0x12   : > { %v1476_v53 = vld [vmem:[%s2110_s4] ss:$0 sm:$0xff]  ;;  %vm844_vm3 = vcmask 64512   ;;  %s1763_s20 = smov 64   ;;  %s1764_s21 = smov 32   ;;  %vm1022_vm4 = vcmask 523520  }
  0x13   : > { %1570 = vmatpush3.bf16.msra.mxu0 %v1688_v4  ;;  %717 = vmatpush1.bf16.msra.mxu1 %v1703_v29  ;;  %v567_v60 = vld [vmem:[%s2112_s6] sm:$0x7]  ;;  %vm1138_vm5 = vcmask 785920   ;;  %vm1254_vm6 = vcmask 1048320  }
  0x14   : > { %1571 = vmatprep.subr.bf16.mxu0 %v1759_v1  ;;  %718 = vmatprep.subr.bf16.mxu1 %v1705_v31  ;;  %v576_v63 = vrot.slane %v567_v60, %v575_v59  ;;  %v572_v0 = vrot.slane %v567_v60, %v571_v61 }
  0x17   : > { %1572 = vmatpush3.bf16.msra.mxu0 %v1689_v5  ;;  %719 = vmatpush1.bf16.msra.mxu1 %v1707_v32 }
  0x18   : > { %1573 = vmatprep.subr.bf16.mxu0 %v1759_v1  ;;  %720 = vmatprep.subr.bf16.mxu1 %v1709_v34 }
  0x1b   : > { %1574 = vmatpush3.bf16.msra.mxu0 %v1690_v6  ;;  %721 = vmatpush1.bf16.msra.mxu1 %v1711_v35  ;;  %v580_v6 = vrot.slane %v567_v60, %v579_v62 }
  0x1c   : > { %1575 = vmatprep.subr.bf16.mxu0 %v1759_v1  ;;  %722 = vmatprep.subr.bf16.mxu1 %v1713_v37 }
  0x1f   : > { %1576 = vmatpush3.bf16.msra.mxu0 %v1691_v7  ;;  %723 = vmatpush1.bf16.msra.mxu1 %v1715_v38 }
  0x20   : > { %1577 = vmatprep.subr.bf16.mxu0 %v1759_v1  ;;  %724 = vmatprep.subr.bf16.mxu1 %v1717_v40 }
  0x23   : > { %1578 = vmatpush3.bf16.msra.mxu0 %v1692_v8  ;;  %725 = vmatpush1.bf16.msra.mxu1 %v1719_v42 }
  0x24   : > { %1583 = vmatprep.subr.bf16.mxu0 %v1759_v1  ;;  %726 = vmatprep.subr.bf16.mxu1 %v1721_v44 }
  0x26   : > { %1580 = vmatmul.mubr.bf16.vlgmr.msra.gmra.mrb[0].mxu0 %v394_v9 }
  0x27   : > { %1599 = vmatprep.mubr.msk.bf16.mxu0 %vm1760_vm0, %v1759_v1  ;;  %1584 = vmatpush3.bf16.msra.mxu0 %v1696_v20 }
  0x28   : > { %1585 = vmatprep.subr.bf16.mxu0 %v1759_v1  ;;  %727 = vmatpush1.bf16.msra.mxu1 %v1723_v45 }
  0x29   : > { %1603 = vmatprep.subr.bf16.mxu1 %v1759_v1 }
  0x2b   : > { %1586 = vmatpush3.bf16.msra.mxu0 %v1700_v22 }
  0x2c   : > { %1587 = vmatprep.subr.bf16.mxu0 %v1759_v1 }
  0x2f   : > { %1588 = vmatpush3.bf16.msra.mxu0 %v1704_v30 }
  0x30   : > { %1589 = vmatprep.subr.bf16.mxu0 %v1759_v1 }
  0x33   : > { %1590 = vmatpush3.bf16.msra.mxu0 %v1708_v33 }
  0x34   : > { %1591 = vmatprep.subr.bf16.mxu0 %v1759_v1 }
  0x37   : > { %1592 = vmatpush3.bf16.msra.mxu0 %v1712_v36 }
  0x38   : > { %1593 = vmatprep.subr.bf16.mxu0 %v1759_v1 }
  0x3b   : > { %1594 = vmatpush3.bf16.msra.mxu0 %v1716_v39 }
  0x3c   : > { %1595 = vmatprep.subr.bf16.mxu0 %v1759_v1 }
  0x3f   : > { %1596 = vmatpush3.bf16.msra.mxu0 %v1720_v43 }
  0x40   : > { %1597 = vmatprep.subr.bf16.mxu0 %v1759_v1 }
  0x43   : > { %1598 = vmatpush3.bf16.msra.mxu0 %v1724_v46 }
  0x44   : > { %1651 = vmatprep.subr.bf16.mxu0 %v1759_v1 }
  0xf9   : > { %v500_v11 = vpop.f32.mrb[0].mxu0 }
  0xfa   : > { %v1883_v13 = vadd.f32 %v1466_v10, %v500_v11  ;;  %v1581_v14 = vpop.f32.mrb[1].mxu0 }
  0xfb   : > { %v503_v15 = vpop.f32.mrb[2].mxu0 }
  0xfc   : > { %v1372_v16 = vadd.f32 %v1371_v12, %v1883_v13  ;;  %506 = vadd.xlane.f32.xlu0 %v1883_v13  ;;  %v1582_v17 = vpop.f32.mrb[3].mxu0 }
  0xfe   : > { %1373 = vst [vmem:[%s392_s29] sm:$0xff] %v1372_v16 }
 0x189   : > { %v507_v25 = vpop.xlane.xlu0 %506 }
 0x18a   : > { %v509_v26 = vmul.f32 0.0078125, %v507_v25 }
 0x18c   : > { %v510_v27 = vsub.f32 %v1883_v13, %v509_v26 }
 0x18e   : > { %v511_v28 = vmul.f32 %v510_v27, %v510_v27 }
 0x190   : > { %512 = vadd.xlane.f32.xlu0 %v511_v28 }
 0x21d   : > { %v513_v47 = vpop.xlane.xlu0 %512 }
 0x21e   : > { %v514_v48 = vmul.f32 0.0078125, %v513_v47 }
 0x220   : > { %v515_v49 = vadd.f32 1e-05, %v514_v48 }
 0x222   : > { %1733 = vrsqrt.f32 %v515_v49 }
 0x22c   : > { %v1734_v50 = vpop.eup %1733 }
 0x22d   : > { %v517_v52 = vmul.f32 %v1734_v50, %v510_v27 }
 0x22f   : > { %v525_v54 = vmul.f32 %v1475_v51, %v517_v52 }
 0x231   : > { %v533_v55 = vadd.f32 %v1476_v53, %v525_v54 }
 0x233   : > { %v534_v56 = vpack.c.bf16 %v533_v55, %v533_v55 }
 0x235   : > { %745 = vmatmul.mubr.bf16.vlgmr.msra.gmra.mrb[0].mxu1 %v534_v56  ;;  %1600 = vmatmul.mubr.bf16.vlgmr.msra.gmra.mrb[4].mxu0 %v534_v56 }
 0x236   : > { %1605 = vmatprep.mubr.msk.bf16.mxu1 %vm1760_vm0, %v1759_v1  ;;  %1667 = vmatprep.mubr.msk.bf16.mxu0 %vm1760_vm0, %v1759_v1 }
 0x308   : > { %v746_v2 = vpop.f32.mrb[0].mxu1  ;;  %v787_v3 = vpop.f32.mrb[4].mxu0 }
 0x309   : > { %v748_v4 = vpop.f32.mrb[1].mxu1  ;;  %v1601_v5 = vpop.f32.mrb[5].mxu0  ;;  %v747_v12 = vadd.f32 %v746_v2, %v572_v0  ;;  %v788_v15 = vadd.f32 %v787_v3, %v580_v6 }
 0x30a   : > { %v749_v7 = vadd.f32 %v748_v4, %v576_v63  ;;  %v750_v8 = vpop.f32.mrb[2].mxu1  ;;  %v790_v9 = vpop.f32.mrb[6].mxu0 }
 0x30b   : > { %v751_v10 = vpop.f32.mrb[3].mxu1  ;;  %v1602_v11 = vpop.f32.mrb[7].mxu0  ;;  %v793_v17 = vmul.f32 0.17677669, %v747_v12  ;;  %v1994_v18 = vpack.c.bf16 %v788_v15, %v788_v15 }
 0x30c   : > { %v1987_v14 = vpack.c.bf16 %v749_v7, %v749_v7 }
 0x30d   : > { %v1996_v19 = vpack.c.bf16 %v793_v17, %v793_v17  ;;  %v862_v20 = vsel %vm860_vm2, %v1994_v18, 0 }
 0x30e   : > { %909 = vrot.lane.b32.xlu0 %v1987_v14, %s1762_s19  ;;  %v802_v16 = vsel %vm797_vm1, %v1987_v14, 0 }
 0x30f   : > { %1604 = vmatpush3.bf16.xpose.msra.mxu1 %v802_v16 }
 0x310   : > { %1609 = vmatprep.subr.bf16.mxu1 %v1759_v1 }
 0x316   : > { %1606 = vmatmul.mubr.msk.bf16.vlgmr.msra.gmra.mrb[4].mxu1 %vm797_vm1, %v1996_v19 }
 0x317   : > { %1610 = vmatpush3.bf16.msra.mxu1 %v862_v20  ;;  %1611 = vmatprep.mubr.msk.bf16.mxu1 %vm1760_vm0, %v1759_v1 }
 0x318   : > { %1615 = vmatprep.subr.bf16.mxu1 %v1759_v1 }
 0x380   : > { %v910_v34 = vpop.permute.xlu0 %909 }
 0x381   : > { %v915_v36 = vsel %vm797_vm1, %v910_v34, 0 }
 0x3e9   : > { %v838_v21 = vpop.f32.mrb[4].mxu1 }
 0x3ea   : > { %v1607_v22 = vpop.f32.mrb[5].mxu1  ;;  %v845_v23 = vsel %vm844_vm3, %v838_v21, -inf }
 0x3eb   : > { %846 = vmax.xlane.f32.xlu1 %v845_v23  ;;  %v841_v24 = vpop.f32.mrb[6].mxu1 }
 0x3ec   : > { %v1608_v25 = vpop.f32.mrb[7].mxu1 }
 0x478   : > { %v847_v26 = vpop.xlane.xlu1 %846 }
 0x479   : > { %v848_v27 = vsub.f32 %v838_v21, %v847_v26 }
 0x47b   : > { %v849_v28 = vmul.f32 1.442695, %v848_v27 }
 0x47d   : > { %1735 = vpow2.f32 %v849_v28 }
 0x487   : > { %v1736_v29 = vpop.eup %1735 }
 0x488   : > { %v851_v30 = vsel %vm844_vm3, %v1736_v29, 0.0 }
 0x489   : > { %852 = vadd.xlane.f32.xlu1 %v851_v30 }
 0x49a   : > { %906 = vrot.lane.b32.xlu1 %v1996_v19, %s1762_s19 }
 0x516   : > { %v853_v31 = vpop.xlane.xlu1 %852 }
 0x517   : > { %1737 = vrcp.f32 %v853_v31 }
 0x51a   : > { %v907_v37 = vpop.permute.xlu1 %906 }
 0x521   : > { %v1738_v32 = vpop.eup %1737 }
 0x522   : > { %v855_v33 = vmul.f32 %v1738_v32, %v1736_v29 }
 0x524   : > { %v856_v35 = vpack.c.bf16 %v855_v33, %v855_v33 }
 0x526   : > { %1612 = vmatmul.mubr.msk.bf16.vlgmr.msra.gmra.mrb[8].mxu1 %vm844_vm3, %v856_v35 }
 0x527   : > { %1616 = vmatpush3.bf16.xpose.msra.mxu1 %v915_v36  ;;  %1617 = vmatprep.mubr.msk.bf16.mxu1 %vm1760_vm0, %v1759_v1 }
 0x528   : > { %1621 = vmatprep.subr.bf16.mxu1 %v1759_v1 }
 0x52e   : > { %1618 = vmatmul.mubr.msk.bf16.vlgmr.msra.gmra.mrb[12].mxu1 %vm797_vm1, %v907_v37 }
 0x52f   : > { %1623 = vmatprep.mubr.msk.bf16.mxu1 %vm1760_vm0, %v1759_v1 }
 0x5f9   : > { %v898_v38 = vpop.f32.mrb[8].mxu1 }
 0x5fa   : > { %904 = vst.msk [vmem:[#allocation2] sm:$0xff] %vm797_vm1, %v898_v38  ;;  %v1613_v39 = vpop.f32.mrb[9].mxu1 }
 0x5fb   : > { %v901_v40 = vpop.f32.mrb[10].mxu1 }
 0x5fc   : > { %v1614_v41 = vpop.f32.mrb[11].mxu1 }
 0x601   : > { %v951_v42 = vpop.f32.mrb[12].mxu1 }
 0x602   : > { %v1619_v43 = vpop.f32.mrb[13].mxu1  ;;  %v957_v44 = vsel %vm844_vm3, %v951_v42, -inf }
 0x603   : > { %958 = vmax.xlane.f32.xlu1 %v957_v44  ;;  %v954_v45 = vpop.f32.mrb[14].mxu1  ;;  %v1725_v44 = vld [vmem:[%s2113_s7] sm:$0xff]  }
 0x604   : > { %v1620_v46 = vpop.f32.mrb[15].mxu1  ;;  %1652 = vmatpush3.bf16.msra.mxu0 %v1725_v44  ;;  %v1726_v45 = vld [vmem:[%s2113_s7 + $0x8] sm:$0xff]  }
 0x605   : > { %1653 = vmatprep.subr.bf16.mxu0 %v1759_v1  ;;  %v1727_v46 = vld [vmem:[%s2113_s7 + $0x10] sm:$0xff]  }
 0x608   : > { %1654 = vmatpush3.bf16.msra.mxu0 %v1726_v45 }
 0x609   : > { %1655 = vmatprep.subr.bf16.mxu0 %v1759_v1 }
 0x60c   : > { %1656 = vmatpush3.bf16.msra.mxu0 %v1727_v46 }
 0x60d   : > { %1657 = vmatprep.subr.bf16.mxu0 %v1759_v1 }
 0x614   : > { %1026 = vrot.lane.b32.xlu1 %v1987_v14, %s1763_s20 }
 0x618   : > { %1024 = vrot.lane.b32.xlu1 %v1996_v19, %s1763_s20 }
 0x690   : > { %v959_v47 = vpop.xlane.xlu1 %958 }
 0x691   : > { %v960_v48 = vsub.f32 %v951_v42, %v959_v47  ;;  %v1728_v47 = vld [vmem:[%s2113_s7 + $0x18] sm:$0xff]  }
 0x692   : > { %1658 = vmatpush3.bf16.msra.mxu0 %v1728_v47 }
 0x693   : > { %v961_v49 = vmul.f32 1.442695, %v960_v48  ;;  %v1729_v48 = vld [vmem:[%s2113_s7 + $0x20] sm:$0xff]   ;;  %1659 = vmatprep.subr.bf16.mxu0 %v1759_v1 }
 0x694   : > { %v1027_v57 = vpop.permute.xlu1 %1026 }
 0x695   : > { %1739 = vpow2.f32 %v961_v49  ;;  %v1032_v59 = vsel %vm797_vm1, %v1027_v57, 0  ;;  %v1730_v49 = vld [vmem:[%s2113_s7 + $0x28] sm:$0xff]  }
 0x696   : > { %1660 = vmatpush3.bf16.msra.mxu0 %v1729_v48 }
 0x697   : > { %1661 = vmatprep.subr.bf16.mxu0 %v1759_v1 }
 0x698   : > { %v1025_v60 = vpop.permute.xlu1 %1024 }
 0x69a   : > { %1662 = vmatpush3.bf16.msra.mxu0 %v1730_v49 }
 0x69b   : > { %1663 = vmatprep.subr.bf16.mxu0 %v1759_v1 }
 0x69f   : > { %v1740_v50 = vpop.eup %1739 }
 0x6a0   : > { %v963_v51 = vsel %vm844_vm3, %v1740_v50, 0.0 }
 0x6a1   : > { %964 = vadd.xlane.f32.xlu0 %v963_v51  ;;  %v1732_v51 = vld [vmem:[%s2113_s7 + $0x38] sm:$0xff]  }
 0x6b7   : > { %970 = vrot.lane.b32.xlu0 %v1994_v18, %s1762_s19 }
 0x72e   : > { %v965_v52 = vpop.xlane.xlu0 %964 }
 0x72f   : > { %1741 = vrcp.f32 %v965_v52 }
 0x732   : > { %v971_v53 = vpop.permute.xlu0 %970 }
 0x733   : > { %v976_v54 = vsel %vm860_vm2, %v971_v53, 0 }
 0x734   : > { %1622 = vmatpush3.bf16.msra.mxu1 %v976_v54 }
 0x735   : > { %1627 = vmatprep.subr.bf16.mxu1 %v1759_v1 }
 0x739   : > { %v1742_v55 = vpop.eup %1741 }
 0x73a   : > { %v967_v56 = vmul.f32 %v1742_v55, %v1740_v50  ;;  %v1731_v50 = vld [vmem:[%s2113_s7 + $0x30] sm:$0xff]  }
 0x73b   : > { %1664 = vmatpush3.bf16.msra.mxu0 %v1731_v50 }
 0x73c   : > { %v968_v58 = vpack.c.bf16 %v967_v56, %v967_v56  ;;  %1665 = vmatprep.subr.bf16.mxu0 %v1759_v1 }
 0x73e   : > { %1624 = vmatmul.mubr.msk.bf16.vlgmr.msra.gmra.mrb[16].mxu1 %vm844_vm3, %v968_v58 }
 0x73f   : > { %1628 = vmatpush3.bf16.xpose.msra.mxu1 %v1032_v59  ;;  %1629 = vmatprep.mubr.msk.bf16.mxu1 %vm1760_vm0, %v1759_v1  ;;  %v1509_v59 = vld [vmem:[%s2114_s8] ss:$0 sm:$0xff] }
 0x740   : > { %1633 = vmatprep.subr.bf16.mxu1 %v1759_v1  ;;  %1666 = vmatpush3.bf16.msra.mxu0 %v1732_v51 }
 0x746   : > { %1630 = vmatmul.mubr.msk.bf16.vlgmr.msra.gmra.mrb[20].mxu1 %vm797_vm1, %v1025_v60 }
 0x747   : > { %1635 = vmatprep.mubr.msk.bf16.mxu1 %vm1760_vm0, %v1759_v1 }
 0x811   : > { %v1012_v61 = vpop.f32.mrb[16].mxu1 }
 0x812   : > { %v1625_v62 = vpop.f32.mrb[17].mxu1 }
 0x813   : > { %v1015_v63 = vpop.f32.mrb[18].mxu1 }
 0x814   : > { %v1626_v0 = vpop.f32.mrb[19].mxu1 }
 0x819   : > { %v1068_v2 = vpop.f32.mrb[20].mxu1 }
 0x81a   : > { %v1631_v3 = vpop.f32.mrb[21].mxu1  ;;  %v1074_v4 = vsel %vm844_vm3, %v1068_v2, -inf }
 0x81b   : > { %1075 = vmax.xlane.f32.xlu1 %v1074_v4  ;;  %v1071_v5 = vpop.f32.mrb[22].mxu1 }
 0x81c   : > { %v1632_v6 = vpop.f32.mrb[23].mxu1 }
 0x82c   : > { %1142 = vrot.lane.b32.xlu1 %v1987_v14, %s1764_s21 }
 0x830   : > { %1140 = vrot.lane.b32.xlu1 %v1996_v19, %s1764_s21 }
 0x8a8   : > { %v1076_v7 = vpop.xlane.xlu1 %1075 }
 0x8a9   : > { %v1077_v8 = vsub.f32 %v1068_v2, %v1076_v7 }
 0x8ab   : > { %v1078_v9 = vmul.f32 1.442695, %v1077_v8 }
 0x8ac   : > { %v1143_v19 = vpop.permute.xlu1 %1142 }
 0x8ad   : > { %1743 = vpow2.f32 %v1078_v9  ;;  %v1148_v21 = vsel %vm797_vm1, %v1143_v19, 0 }
 0x8b0   : > { %v1141_v22 = vpop.permute.xlu1 %1140 }
 0x8b7   : > { %v1744_v10 = vpop.eup %1743 }
 0x8b8   : > { %v1080_v11 = vsel %vm844_vm3, %v1744_v10, 0.0 }
 0x8b9   : > { %1081 = vadd.xlane.f32.xlu0 %v1080_v11 }
 0x8cf   : > { %1086 = vrot.lane.b32.xlu0 %v1994_v18, %s1763_s20 }
 0x946   : > { %v1082_v12 = vpop.xlane.xlu0 %1081 }
 0x947   : > { %1745 = vrcp.f32 %v1082_v12 }
 0x94a   : > { %v1087_v15 = vpop.permute.xlu0 %1086 }
 0x94b   : > { %v1092_v16 = vsel %vm860_vm2, %v1087_v15, 0 }
 0x94c   : > { %1634 = vmatpush3.bf16.msra.mxu1 %v1092_v16 }
 0x94d   : > { %1639 = vmatprep.subr.bf16.mxu1 %v1759_v1 }
 0x951   : > { %v1746_v14 = vpop.eup %1745 }
 0x952   : > { %v1084_v17 = vmul.f32 %v1746_v14, %v1744_v10 }
 0x954   : > { %v1085_v20 = vpack.c.bf16 %v1084_v17, %v1084_v17 }
 0x956   : > { %1636 = vmatmul.mubr.msk.bf16.vlgmr.msra.gmra.mrb[24].mxu1 %vm844_vm3, %v1085_v20 }
 0x957   : > { %1640 = vmatpush3.bf16.xpose.msra.mxu1 %v1148_v21  ;;  %1641 = vmatprep.mubr.msk.bf16.mxu1 %vm1760_vm0, %v1759_v1 }
 0x958   : > { %1645 = vmatprep.subr.bf16.mxu1 %v1759_v1 }
 0x95e   : > { %1642 = vmatmul.mubr.msk.bf16.vlgmr.msra.gmra.mrb[28].mxu1 %vm797_vm1, %v1141_v22 }
 0x95f   : > { %1647 = vmatprep.mubr.msk.bf16.mxu1 %vm1760_vm0, %v1759_v1 }
 0xa29   : > { %v1128_v23 = vpop.f32.mrb[24].mxu1 }
 0xa2a   : > { %v1637_v24 = vpop.f32.mrb[25].mxu1 }
 0xa2b   : > { %v1131_v25 = vpop.f32.mrb[26].mxu1 }
 0xa2c   : > { %v1638_v26 = vpop.f32.mrb[27].mxu1 }
 0xa31   : > { %v1184_v27 = vpop.f32.mrb[28].mxu1 }
 0xa32   : > { %v1643_v28 = vpop.f32.mrb[29].mxu1  ;;  %v1190_v29 = vsel %vm844_vm3, %v1184_v27, -inf }
 0xa33   : > { %1191 = vmax.xlane.f32.xlu0 %v1190_v29  ;;  %v1187_v30 = vpop.f32.mrb[30].mxu1 }
 0xa34   : > { %v1644_v31 = vpop.f32.mrb[31].mxu1 }
 0xa49   : > { %1202 = vrot.lane.b32.xlu0 %v1994_v18, %s1764_s21 }
 0xa4d   : > { %1135 = vrot.lane.b32.xlu0 %v1128_v23, %s1763_s20 }
 0xac0   : > { %v1192_v32 = vpop.xlane.xlu0 %1191 }
 0xac1   : > { %v1193_v33 = vsub.f32 %v1184_v27, %v1192_v32 }
 0xac3   : > { %v1194_v34 = vmul.f32 1.442695, %v1193_v33 }
 0xac4   : > { %v1203_v35 = vpop.permute.xlu0 %1202 }
 0xac5   : > { %1747 = vpow2.f32 %v1194_v34  ;;  %v1208_v36 = vsel %vm860_vm2, %v1203_v35, 0 }
 0xac6   : > { %1646 = vmatpush3.bf16.msra.mxu1 %v1208_v36 }
 0xac8   : > { %v1136_v40 = vpop.permute.xlu0 %1135 }
 0xacf   : > { %v1748_v37 = vpop.eup %1747 }
 0xad0   : > { %v1196_v38 = vsel %vm844_vm3, %v1748_v37, 0.0 }
 0xad1   : > { %1197 = vadd.xlane.f32.xlu1 %v1196_v38 }
 0xae2   : > { %1019 = vrot.lane.b32.xlu1 %v1012_v61, %s1764_s21 }
 0xb5e   : > { %v1198_v39 = vpop.xlane.xlu1 %1197 }
 0xb5f   : > { %1749 = vrcp.f32 %v1198_v39 }
 0xb62   : > { %v1020_v18 = vpop.permute.xlu1 %1019 }
 0xb63   : > { %1023 = vst.msk [vmem:[#allocation2] sm:$0xff] %vm1022_vm4, %v1020_v18 }
 0xb64   : > { %1139 = vst.msk [vmem:[#allocation2] sm:$0xff] %vm1138_vm5, %v1136_v40 }
 0xb69   : > { %v1750_v41 = vpop.eup %1749 }
 0xb6a   : > { %v1200_v42 = vmul.f32 %v1750_v41, %v1748_v37 }
 0xb6c   : > { %v1201_v43 = vpack.c.bf16 %v1200_v42, %v1200_v42 }
 0xb6e   : > { %1648 = vmatmul.mubr.msk.bf16.vlgmr.msra.gmra.mrb[32].mxu1 %vm844_vm3, %v1201_v43 }
 0xc41   : > { %v1244_v52 = vpop.f32.mrb[32].mxu1 }
 0xc42   : > { %1251 = vrot.lane.b32.xlu1 %v1244_v52, %s1762_s19  ;;  %v1649_v53 = vpop.f32.mrb[33].mxu1  ;;  %s388_s19 = scalar_lea.vmem %s2116_s10, %s1464_s24 }
 0xc43   : > { %v1247_v54 = vpop.f32.mrb[34].mxu1 }
 0xc44   : > { %v1650_v55 = vpop.f32.mrb[35].mxu1 }
 0xcb4   : > { %v1252_v56 = vpop.permute.xlu1 %1251 }
 0xcb5   : > { %1255 = vst.msk [vmem:[#allocation2] sm:$0xff] %vm1254_vm6, %v1252_v56 }
 0xcbc   : > { %v1256_v57 = vld [vmem:[#allocation2] sm:$0xff] }
 0xcbd   : > { %v1257_v58 = vpack.c.bf16 %v1256_v57, %v1256_v57 }
 0xcbf   : > { %1668 = vmatmul.mubr.bf16.vlgmr.msra.gmra.mrb[8].mxu0 %v1257_v58 }
 0xd92   : > { %v1363_v60 = vpop.f32.mrb[8].mxu0 }
 0xd93   : > { %v1364_v1 = vadd.f32 %v1509_v59, %v1363_v60  ;;  %v1669_v61 = vpop.f32.mrb[9].mxu0 }
 0xd94   : > { %v1366_v62 = vpop.f32.mrb[10].mxu0 }
 0xd95   : > { %v1369_v63 = vadd.f32 %v1364_v1, %v1883_v13  ;;  %v1670_v0 = vpop.f32.mrb[11].mxu0 }
 0xd97   : > { %1370 = vst [vmem:[%s388_s19] sm:$0xff] %v1369_v63 }
 0xd98 PF: > { %s22_s17 = sadd.s32 1, %s1757_s17  }
 0xd99   : > { %p19_p4 = scmp.ge.s32.totalorder %s22_s17, 4  }
 0xd9b   :  { %21 = sbr.rel (!%p19_p4) target bundleno = 1 (0x1), region = 102 }

</bundles_post_ra>
